<compile_context>
chip_gen: v7x
topology: tpu7x:2x2x1
jax: 0.10.0
libtpu: 0.0.40
codegen_flags: <defaults>
</compile_context>

<pallas_src>
import functools

import jax
import jax.numpy as jnp
from jax.experimental import pallas as pl
from jax.experimental.pallas import tpu as pltpu


_SUBLANE = 8
_LANE = 128
# Budget for double-buffered input tiles (3 inputs x 2 buffers, lane-padded).
_VMEM_INPUT_BUDGET_BYTES = 20 * 1024 * 1024
_MAX_TILE_ROWS = 8192
# <= physical VMEM on every generation (v5e/v6e 128 MiB, v7x 64 MiB).
_VMEM_LIMIT_BYTES = 32 * 1024 * 1024


def _triplet_kernel(pos_ref, neg_ref, sim_ref, out_ref, *, margin):
    # Blocks are [TILE_R, N]: rows on sublanes, reduce axis N on lanes (XLU).
    pos = pos_ref[...]
    neg = neg_ref[...]
    sim = sim_ref[...]

    # Multiply in native dtype; accumulate / reduce in float32.
    pos_term = jnp.sum((pos * sim).astype(jnp.float32), axis=-1, keepdims=True)
    neg_term = jnp.max((neg * sim).astype(jnp.float32), axis=-1, keepdims=True)

    tloss = jnp.maximum(neg_term - pos_term + margin, 0.0)
    out_ref[...] = tloss.astype(out_ref.dtype)


def _pick_tile_rows(n, itemsize):
    """Largest row tile (multiple of 8) whose double-buffered inputs fit VMEM."""
    lane_n = pl.cdiv(n, _LANE) * _LANE          # VMEM lane-pads the last dim
    bytes_per_row = 3 * 2 * lane_n * itemsize + 2 * 4
    rows = _VMEM_INPUT_BUDGET_BYTES // max(bytes_per_row, 1)
    rows = (rows // _SUBLANE) * _SUBLANE
    return int(max(_SUBLANE, min(rows, _MAX_TILE_ROWS)))


def my_triplet(pos_weights, neg_weights, similarity, *, margin, tile_rows=None):
    """Pallas TPU implementation of my_triplet.forward. Returns [B, S]."""
    assert pos_weights.shape == neg_weights.shape == similarity.shape
    B, S, N = similarity.shape
    R = B * S
    out_dtype = similarity.dtype

    if tile_rows is None:
        tile_rows = _pick_tile_rows(N, jnp.dtype(similarity.dtype).itemsize)

    if R <= tile_rows:
        tile_r = R  # single grid step, full-extent block (no divisibility needed)
    else:
        tile_r = max(_SUBLANE, (int(tile_rows) // _SUBLANE) * _SUBLANE)

    # Free, contiguous collapse — no HBM pass.
    pos2 = pos_weights.reshape(R, N)
    neg2 = neg_weights.reshape(R, N)
    sim2 = similarity.reshape(R, N)

    grid = (pl.cdiv(R, tile_r),)
    in_spec = pl.BlockSpec((tile_r, N), lambda i: (i, 0))
    out_spec = pl.BlockSpec((tile_r, 1), lambda i: (i, 0))

    out = pl.pallas_call(
        functools.partial(_triplet_kernel, margin=float(margin)),
        out_shape=jax.ShapeDtypeStruct((R, 1), out_dtype),
        grid_spec=pltpu.PrefetchScalarGridSpec(
            num_scalar_prefetch=0,
            grid=grid,
            in_specs=[in_spec, in_spec, in_spec],
            out_specs=out_spec,
        ),
        compiler_params=pltpu.CompilerParams(
            # Independent row tiles: lets v7x shard across its 2 TensorCores.
            dimension_semantics=("parallel",),
            vmem_limit_bytes=_VMEM_LIMIT_BYTES,
        ),
    )(pos2, neg2, sim2)

    return out.reshape(B, S)


def _reference(pos_weights, neg_weights, similarity, margin):
    pos_term = jnp.sum(pos_weights * similarity, axis=-1)
    neg_term = jnp.max(neg_weights * similarity, axis=-1)
    return jnp.maximum(neg_term - pos_term + margin, 0.0)


if __name__ == "__main__":
    margin = 0.2
    key = jax.random.PRNGKey(0)
    k1, k2, k3, k4, k5, k6 = jax.random.split(key, 6)

    # Small case (single grid step path).
    B, S, N = 2, 8, 32
    pos_weights = jax.random.uniform(k1, (B, S, N), dtype=jnp.float32)
    neg_weights = jax.random.uniform(k2, (B, S, N), dtype=jnp.float32)
    similarity = jax.random.normal(k3, (B, S, N), dtype=jnp.float32)

    out = my_triplet(pos_weights, neg_weights, similarity, margin=margin)
    out = jax.block_until_ready(out)
    ref = _reference(pos_weights, neg_weights, similarity, margin)
    assert out.shape == (B, S)
    assert jnp.allclose(out, ref, atol=1e-5, rtol=1e-5)

    # Larger case forcing the multi-step grid path with a ragged last block.
    B2, S2, N2 = 2, 200, 48
    pw2 = jax.random.uniform(k4, (B2, S2, N2), dtype=jnp.float32)
    nw2 = jax.random.uniform(k5, (B2, S2, N2), dtype=jnp.float32)
    sm2 = jax.random.normal(k6, (B2, S2, N2), dtype=jnp.float32)
    out2 = my_triplet(pw2, nw2, sm2, margin=margin, tile_rows=128)
    out2 = jax.block_until_ready(out2)
    ref2 = _reference(pw2, nw2, sm2, margin)
    assert out2.shape == (B2, S2)
    assert jnp.allclose(out2, ref2, atol=1e-5, rtol=1e-5)

    print("KERNEL_OK")
</pallas_src>

<mosaic_0001>
module attributes {stable_mosaic.version = 11 : i64} {
  func.func @_triplet_kernel(%arg0: i32, %arg1: memref<16x32xf32, #tpu.memory_space<vmem>>, %arg2: memref<16x32xf32, #tpu.memory_space<vmem>>, %arg3: memref<16x32xf32, #tpu.memory_space<vmem>>, %arg4: memref<16x1xf32, #tpu.memory_space<vmem>>) attributes {dimension_semantics = [#tpu.dimension_semantics<parallel>], iteration_bounds = array<i64: 1>, scalar_prefetch = 0 : i64, scratch_operands = 0 : i64, tpu.core_type = #tpu.core_type<tc>, window_params = [{transform_indices = @transform_0, window_bounds = array<i64: 16, 32>}, {transform_indices = @transform_1, window_bounds = array<i64: 16, 32>}, {transform_indices = @transform_2, window_bounds = array<i64: 16, 32>}, {transform_indices = @transform_3, window_bounds = array<i64: 16, 1>}]} {
    %c0 = arith.constant 0 : index
    %c0_0 = arith.constant 0 : index
    %0 = vector.load %arg1[%c0, %c0_0] : memref<16x32xf32, #tpu.memory_space<vmem>>, vector<16x32xf32>
    %c0_1 = arith.constant 0 : index
    %c0_2 = arith.constant 0 : index
    %1 = vector.load %arg2[%c0_1, %c0_2] : memref<16x32xf32, #tpu.memory_space<vmem>>, vector<16x32xf32>
    %c0_3 = arith.constant 0 : index
    %c0_4 = arith.constant 0 : index
    %2 = vector.load %arg3[%c0_3, %c0_4] : memref<16x32xf32, #tpu.memory_space<vmem>>, vector<16x32xf32>
    %3 = arith.mulf %0, %2 : vector<16x32xf32>
    %cst = arith.constant dense<0.000000e+00> : vector<16xf32>
    %4 = vector.multi_reduction <add>, %3, %cst [1] : vector<16x32xf32> to vector<16xf32>
    %5 = vector.shape_cast %4 : vector<16xf32> to vector<16x1xf32>
    %6 = arith.mulf %1, %2 : vector<16x32xf32>
    %cst_5 = arith.constant dense<0xFF800000> : vector<16xf32>
    %7 = vector.multi_reduction <maximumf>, %6, %cst_5 [1] : vector<16x32xf32> to vector<16xf32>
    %8 = vector.shape_cast %7 : vector<16xf32> to vector<16x1xf32>
    %9 = arith.subf %8, %5 : vector<16x1xf32>
    %cst_6 = arith.constant 2.000000e-01 : f32
    %10 = vector.broadcast %cst_6 : f32 to vector<16x1xf32>
    %11 = arith.addf %9, %10 : vector<16x1xf32>
    %cst_7 = arith.constant 0.000000e+00 : f32
    %12 = vector.broadcast %cst_7 : f32 to vector<16x1xf32>
    %13 = arith.maximumf %11, %12 : vector<16x1xf32>
    %c0_8 = arith.constant 0 : index
    %c0_9 = arith.constant 0 : index
    %14 = vector.load %arg4[%c0_8, %c0_9] : memref<16x1xf32, #tpu.memory_space<vmem>>, vector<16x1xf32>
    tpu.vector_store %arg4[%c0_8, %c0_9], %13 {strides = array<i32>} : memref<16x1xf32, #tpu.memory_space<vmem>>, vector<16x1xf32>,
    return
  }
  func.func @transform_0(%arg0: i32) -> (i32, i32) {
    %c0_i32 = arith.constant 0 : i32
    %c0_i32_0 = arith.constant 0 : i32
    return %arg0, %c0_i32 : i32, i32
  }
  func.func @transform_1(%arg0: i32) -> (i32, i32) {
    %c0_i32 = arith.constant 0 : i32
    %c0_i32_0 = arith.constant 0 : i32
    return %arg0, %c0_i32 : i32, i32
  }
  func.func @transform_2(%arg0: i32) -> (i32, i32) {
    %c0_i32 = arith.constant 0 : i32
    %c0_i32_0 = arith.constant 0 : i32
    return %arg0, %c0_i32 : i32, i32
  }
  func.func @transform_3(%arg0: i32) -> (i32, i32) {
    %c0_i32 = arith.constant 0 : i32
    %c0_i32_0 = arith.constant 0 : i32
    return %arg0, %c0_i32 : i32, i32
  }
}

</mosaic_0001>

<bundles_post_ra>
// kernel: tpu_custom_call.1
= control target key start
LH: loop header
LB: loop body
LE: loop exit
PB: predicated region body
PF: predicated region fallthrough
CT: control target
= control target key end

     0   :  { %8 = vsyncpa [#allocation3], 0  ;;  %s251_s0 = inlined_call_operand.hbm [shape: f32[16,32], index: 0, kind: input, shape index: {}]   ;;  %s252_s1 = inlined_call_operand.hbm [shape: f32[16,32], index: 1, kind: input, shape index: {}]   ;;  %s253_s2 = inlined_call_operand.hbm [shape: f32[16,32], index: 2, kind: input, shape index: {}]   ;;  %s254_s3 = inlined_call_operand.vmem [shape: f32[16,1], index: 3, kind: output, shape index: {}]  }
   0x1   :  { %9 = vsyncpa [#allocation5], 0  ;;  %s168_s12 = smov [#allocation4]   ;;  %s169_s14 = smov [#allocation2]  }
   0x2   :  { %s27_s13 = sshll.u32 %s168_s12, 4  ;;  %s15_s15 = sshll.u32 %s169_s14, 4  ;;  %s28_s13 = int_to_ptr.vmem [resolvable:$true] %s27_s13  ;;  %s193_s15 = int_to_ptr.vmem [resolvable:$true] %s15_s15 }
   0x3   :  { %s98_s18 = scalar_lea.hbm %s252_s1, 256 }
   0x4   :  { %p99_p0 = scmp.ne.s32.totalorder %s252_s1, %s98_s18  ;;  %p102_p1 = scmp.lt.u32.totalorder %s98_s18, %s252_s1 }
   0x6   :  { %p104_p2 = pnand %p102_p1, %p99_p0 }
   0x8   :  { %107 = shalt.err (!%p104_p2)
}
   0x9   :  { %s108_s23 = scalar_lea.vmem %s28_s13, 256  ;;  %p113_p4 = scmp.lt.s32.totalorder %s28_s13, %s28_s13 }
   0xa   :  { %p109_p3 = scmp.ne.s32.totalorder %s28_s13, %s108_s23  ;;  %p114_p5 = scmp.lt.s32.totalorder %s108_s23, %s108_s23 }
   0xc   :  { %p115_p6 = por %p114_p5, %p113_p4 }
   0xe   :  { %p116_p7 = pnand %p115_p6, %p109_p3 }
  0x10   :  { %119 = shalt.err (!%p116_p7)
}
  0x11   :  { %s170_s24 = smov 128   ;;  %s171_s25 = smov 8  }
  0x12   :  { %33 = dma.hbm_to_vmem [thread:$0]  %s252_s1, 256, %s28_s13, [#allocation5], %s170_s24, %s170_s24, %s171_s25  }
  0x13   :  { %s120_s30 = scalar_lea.hbm %s251_s0, 256 }
  0x14   :  { %p121_p8 = scmp.ne.s32.totalorder %s251_s0, %s120_s30  ;;  %p124_p9 = scmp.lt.u32.totalorder %s120_s30, %s251_s0 }
  0x16   :  { %p126_p10 = pnand %p124_p9, %p121_p8 }
  0x18   :  { %129 = shalt.err (!%p126_p10)
}
  0x19   :  { %s130_s8 = scalar_lea.vmem %s193_s15, 256  ;;  %p135_p12 = scmp.lt.s32.totalorder %s193_s15, %s193_s15 }
  0x1a   :  { %p131_p11 = scmp.ne.s32.totalorder %s193_s15, %s130_s8  ;;  %p136_p13 = scmp.lt.s32.totalorder %s130_s8, %s130_s8 }
  0x1c   :  { %p137_p0 = por %p136_p13, %p135_p12 }
  0x1e   :  { %p138_p1 = pnand %p137_p0, %p131_p11 }
  0x20   :  { %141 = shalt.err (!%p138_p1)
}
  0x21   :  { %21 = dma.hbm_to_vmem [thread:$0]  %s251_s0, 256, %s193_s15, [#allocation3], %s170_s24, %s170_s24, %s171_s25  }
  0x22   :  { %s172_s10 = smov [#allocation6]   ;;  %s142_s14 = scalar_lea.hbm %s253_s2, 256 }
  0x23   :  { %s39_s11 = sshll.u32 %s172_s10, 4  ;;  %p143_p2 = scmp.ne.s32.totalorder %s253_s2, %s142_s14  ;;  %s40_s11 = int_to_ptr.vmem [resolvable:$true] %s39_s11 }
  0x24   :  { %p146_p3 = scmp.lt.u32.totalorder %s142_s14, %s253_s2 }
  0x26   :  { %p148_p4 = pnand %p146_p3, %p143_p2 }
  0x28   :  { %151 = shalt.err (!%p148_p4)
}
  0x29   :  { %s152_s20 = scalar_lea.vmem %s40_s11, 256  ;;  %p157_p6 = scmp.lt.s32.totalorder %s40_s11, %s40_s11 }
  0x2a   :  { %p153_p5 = scmp.ne.s32.totalorder %s40_s11, %s152_s20  ;;  %p158_p7 = scmp.lt.s32.totalorder %s152_s20, %s152_s20 }
  0x2c   :  { %p159_p8 = por %p158_p7, %p157_p6 }
  0x2e   :  { %p160_p9 = pnand %p159_p8, %p153_p5 }
  0x30   :  { %163 = shalt.err (!%p160_p9)
}
  0x31   :  { %45 = dma.hbm_to_vmem [thread:$0]  %s253_s2, 256, %s40_s11, [#allocation5], %s170_s24, %s170_s24, %s171_s25  }
  0x32   :  { %164 = dma.done.wait [#allocation3], 256  }
  0x33   :  { %165 = vsyncadd [#allocation3], 4294967040 }
  0x34   :  { %166 = dma.done.wait [#allocation5], 512  }
  0x35   :  { %167 = vsyncadd [#allocation5], 4294966784  ;;  %v57_v0 = vld [vmem:[#allocation4] sm:$0xff]  ;;  %v59_v1 = vld [vmem:[#allocation6] sm:$0xff]  ;;  %vm63_vm0 = vcmask 261120   ;;  %vm84_vm1 = vcmask 7168  }
  0x36   :  { %v55_v2 = vld [vmem:[#allocation2] sm:$0xff]  ;;  %v70_v3 = vmul.f32 %v59_v1, %v57_v0  ;;  %v58_v5 = vld [vmem:[#allocation4 + $0x8] sm:$0xff]  ;;  %v60_v6 = vld [vmem:[#allocation6 + $0x8] sm:$0xff] }
  0x37   :  { %v61_v4 = vmul.f32 %v59_v1, %v55_v2  ;;  %v56_v7 = vld [vmem:[#allocation2 + $0x8] sm:$0xff]  ;;  %v71_v8 = vmul.f32 %v60_v6, %v58_v5 }
  0x38   :  { %v62_v9 = vmul.f32 %v60_v6, %v56_v7  ;;  %v72_v10 = vsel %vm63_vm0, %v70_v3, -inf }
  0x39   :  { %v64_v11 = vsel %vm63_vm0, %v61_v4, 0.0  ;;  %73 = vmax.xlane.f32.xlu1 %v72_v10  ;;  %v75_v12 = vsel %vm63_vm0, %v71_v8, -inf }
  0x3a   :  { %65 = vadd.xlane.f32.xlu0 %v64_v11  ;;  %v67_v13 = vsel %vm63_vm0, %v62_v9, 0.0 }
  0x3d   :  { %76 = vmax.xlane.f32.xlu1 %v75_v12 }
  0x3e   :  { %68 = vadd.xlane.f32.xlu0 %v67_v13 }
  0xc6   :  { %v74_v14 = vpop.xlane.xlu1 %73 }
  0xc7   :  { %v66_v15 = vpop.xlane.xlu0 %65 }
  0xc8   :  { %v78_v16 = vsub.f32 %v74_v14, %v66_v15 }
  0xca   :  { %v80_v17 = vadd.f32 0.2, %v78_v16  ;;  %v77_v18 = vpop.xlane.xlu1 %76 }
  0xcb   :  { %v69_v19 = vpop.xlane.xlu0 %68 }
  0xcc   :  { %v82_v20 = vmax.f32 %v80_v17, 0.0  ;;  %v79_v21 = vsub.f32 %v77_v18, %v69_v19 }
  0xce   :  { %85 = vst.msk [vmem:[%s254_s3] sm:$0xff] %vm84_vm1, %v82_v20  ;;  %v81_v22 = vadd.f32 0.2, %v79_v21 }
  0xd0   :  { %v83_v23 = vmax.f32 %v81_v22, 0.0 }
  0xd2   :  { %86 = vst.msk [vmem:[%s254_s3 + $0x8] sm:$0xff] %vm84_vm1, %v83_v23 }
  0xd3   :  { %91 = vsyncpa [#allocation3], 1 }
  0xd4   :  { %92 = vsyncpa [#allocation5], 1 }

</bundles_post_ra>
